<compile_context>
chip_gen: v7x
topology: tpu7x:2x2x1
jax: 0.10.0
libtpu: 0.0.40
codegen_flags: <defaults>
</compile_context>

<pallas_src>
import functools
import math

import jax
import jax.numpy as jnp
from jax import lax
from jax.experimental import pallas as pl
from jax.experimental.pallas import tpu as pltpu


# --------------------------------------------------------------------------- #
# Per-generation defaults and feature probes                                   #
# --------------------------------------------------------------------------- #
@functools.lru_cache(maxsize=None)
def _tpu_defaults():
    """(vmem_limit_bytes, seq_tile_target) per TPU generation.

    v7x: 64 MiB VMEM/TC -> conservative 48 MiB scoped limit, and the safe default.
    v5e/v6e: 128 MiB VMEM -> raise the scoped limit to ~100 MiB.
    v6e/v7x: 256x256 MXU -> prefer 256-wide sequence tiles; v5e keeps 128.
    """
    vmem_limit = 48 * 1024 * 1024
    seq_target = 128
    try:
        info = pltpu.get_tpu_info()
        vmem = int(getattr(info, "vmem_capacity_bytes", 0) or 0)
        if vmem >= 100 * 1024 * 1024:
            vmem_limit = 100 * 1024 * 1024
        tag = (str(getattr(info, "chip_version", "")) + " " + str(info)).lower()
        if ("v6" in tag) or ("v7" in tag) or ("trillium" in tag):
            seq_target = 256
    except Exception:  # defaults above are always safe
        pass
    return vmem_limit, seq_target


@functools.lru_cache(maxsize=None)
def _single_buffering_supported():
    """Probe whether BlockSpec(pipeline_mode=pl.Buffered(1)) lowers on this JAX/TPU.

    Grid-constant weight blocks gain nothing from double buffering; single-
    buffering them halves their VMEM footprint (important on v7x).
    """
    try:
        def _probe(x_ref, o_ref):
            o_ref[...] = x_ref[...] + 1.0

        f = pl.pallas_call(
            _probe,
            grid=(2,),
            in_specs=[pl.BlockSpec((8, 128), lambda i: (0, 0),
                                   pipeline_mode=pl.Buffered(1))],
            out_specs=pl.BlockSpec((8, 128), lambda i: (i, 0)),
            out_shape=jax.ShapeDtypeStruct((16, 128), jnp.float32),
        )
        jax.jit(f).lower(jax.ShapeDtypeStruct((8, 128), jnp.float32)).compile()
        return True
    except Exception:
        return False


def _const_spec(shape, index_map):
    """BlockSpec for a grid-constant operand (weights / biases / LN params)."""
    if _single_buffering_supported():
        return pl.BlockSpec(shape, index_map, pipeline_mode=pl.Buffered(1))
    return pl.BlockSpec(shape, index_map)


def _compiler_params(dimension_semantics):
    vmem_limit, _ = _tpu_defaults()
    return pltpu.CompilerParams(
        dimension_semantics=tuple(dimension_semantics),
        vmem_limit_bytes=vmem_limit,
    )


def _seq_tile(seq_len, target):
    for t in (target, 256, 128, 64, 32, 16, 8):
        if t <= seq_len and seq_len % t == 0:
            return t
    return seq_len


def _attention_seq_tile(ts, num_heads, seq_len, vmem_limit):
    # Shrink the attention q-tile if the f32 score/probs slabs would crowd VMEM
    # (mainly a v7x concern at long sequence lengths).
    tq = ts
    while tq > 128 and 2 * num_heads * tq * seq_len * 4 > vmem_limit // 3:
        tq //= 2
    return tq if seq_len % tq == 0 else ts


def _intermediate_tile(inter_dim, target=1024):
    if inter_dim <= target:
        return inter_dim
    for t in range(target, 127, -128):
        if inter_dim % t == 0:
            return t
    return inter_dim


# --------------------------------------------------------------------------- #
# Math helpers (f32 inside kernels)                                            #
# --------------------------------------------------------------------------- #
def _layer_norm(v, g, b, eps=1e-12):
    mu = jnp.mean(v, axis=-1, keepdims=True)
    c = v - mu
    var = jnp.mean(c * c, axis=-1, keepdims=True)
    return c * lax.rsqrt(var + eps) * g + b


def _gelu(x):
    # BERT uses the exact (erf-based) GELU.
    return 0.5 * x * (1.0 + lax.erf(x * 0.7071067811865475))


# --------------------------------------------------------------------------- #
# Kernel 1: fused QKV projection -> three lane-dense (B, S, H) outputs          #
# --------------------------------------------------------------------------- #
def _qkv_proj_kernel(x_ref, w_ref, b_ref, q_ref, k_ref, v_ref):
    x = x_ref[0].astype(jnp.bfloat16)                            # (TS, H)
    acc = jnp.dot(x, w_ref[...], preferred_element_type=jnp.float32) + b_ref[...]
    acc = acc.astype(q_ref.dtype)                                # (TS, 3H) bf16
    h = q_ref.shape[-1]
    # Static lane slices (128-aligned at BERT-base scale); no HBM transposes.
    q_ref[0] = acc[:, :h]
    k_ref[0] = acc[:, h:2 * h]
    v_ref[0] = acc[:, 2 * h:]


def _qkv_proj(x, w_qkv, b_qkv, ts):
    B, S, H = x.shape
    H3 = w_qkv.shape[1]
    tile = pl.BlockSpec((1, ts, H), lambda b, s: (b, s, 0))
    out_sds = jax.ShapeDtypeStruct((B, S, H), jnp.bfloat16)
    return pl.pallas_call(
        _qkv_proj_kernel,
        grid=(B, S // ts),
        in_specs=[
            pl.BlockSpec((1, ts, H), lambda b, s: (b, s, 0)),
            _const_spec((H, H3), lambda b, s: (0, 0)),           # fused [Wq|Wk|Wv]
            _const_spec((1, H3), lambda b, s: (0, 0)),           # fused bias
        ],
        out_specs=(tile, tile, tile),
        out_shape=(out_sds, out_sds, out_sds),
        compiler_params=_compiler_params(("parallel", "parallel")),
    )(x, w_qkv, b_qkv)


# --------------------------------------------------------------------------- #
# Kernel 2: multi-head self-attention (heads split in-kernel)                   #
# --------------------------------------------------------------------------- #
def _mha_body(mask_ref, q_ref, k_ref, v_ref, num_heads, head_dim, exact_probs):
    # Scale 1/sqrt(dh) is already folded into Wq/bq.
    q = q_ref[0]                              # (TQ, H) bf16
    k = k_ref[0]                              # (S,  H) bf16
    v = v_ref[0]                              # (S,  H) bf16
    m = mask_ref[0]                           # (1,  S) f32 additive mask

    # Per-head loop: each head is one MXU matmul -- identical MXU work to a
    # head-batched dot_general (batch dims lower to the same per-head matmuls),
    # but every HBM-facing layout stays lane-dense (last dim H or S).
    # Note: QK^T contraction depth is only dh (<= 1/4 of a 256-deep MXU on
    # v6e/v7x); the PV matmul (contraction = S) and dense projections carry
    # MXU utilization, so we don't chase peak here.
    nt_dims = (((1,), (1,)), ((), ()))        # contract last dims: Q @ K^T
    ctx_heads = []
    probs = []
    for h in range(num_heads):
        lo = h * head_dim
        qh = q[:, lo:lo + head_dim]
        kh = k[:, lo:lo + head_dim]
        vh = v[:, lo:lo + head_dim]
        s = lax.dot_general(qh, kh, nt_dims,
                            preferred_element_type=jnp.float32)  # (TQ, S)
        s = s + m
        s = s - jnp.max(s, axis=-1, keepdims=True)               # stable softmax
        p = jnp.exp(s)
        den = jnp.sum(p, axis=-1, keepdims=True)
        if exact_probs:
            p = p / den                                          # exact (probs output)
        else:
            p = p * pl.reciprocal(den, approx=True)              # EUP slot
        ctx_heads.append(jnp.dot(p.astype(vh.dtype), vh,
                                 preferred_element_type=jnp.float32))
        probs.append(p)
    ctx = jnp.concatenate(ctx_heads, axis=-1)                    # (TQ, H) lane-dense
    return ctx, probs


def _mha_kernel(mask_ref, q_ref, k_ref, v_ref, ctx_ref, *, num_heads, head_dim):
    ctx, _ = _mha_body(mask_ref, q_ref, k_ref, v_ref, num_heads, head_dim,
                       exact_probs=False)
    ctx_ref[0] = ctx.astype(ctx_ref.dtype)


def _mha_kernel_probs(mask_ref, q_ref, k_ref, v_ref, ctx_ref, attn_ref, *,
                      num_heads, head_dim):
    ctx, probs = _mha_body(mask_ref, q_ref, k_ref, v_ref, num_heads, head_dim,
                           exact_probs=True)
    for h, p in enumerate(probs):
        attn_ref[0, h] = p.astype(attn_ref.dtype)                # lane-dense (TQ, S)
    ctx_ref[0] = ctx.astype(ctx_ref.dtype)


def _attention(q, k, v, mask_add, tq, num_heads, head_dim, output_attentions,
               probs_dtype):
    B, S, H = q.shape
    # Batch is the OUTER grid axis so the full K/V blocks (index (b,0,0)) are
    # DMA'd once per batch element, not once per q-tile.
    in_specs = [
        pl.BlockSpec((1, 1, S), lambda b, s: (b, 0, 0)),         # additive mask
        pl.BlockSpec((1, tq, H), lambda b, s: (b, s, 0)),        # Q tile
        pl.BlockSpec((1, S, H), lambda b, s: (b, 0, 0)),         # full K
        pl.BlockSpec((1, S, H), lambda b, s: (b, 0, 0)),         # full V
    ]
    ctx_spec = pl.BlockSpec((1, tq, H), lambda b, s: (b, s, 0))
    ctx_shape = jax.ShapeDtypeStruct((B, S, H), jnp.bfloat16)

    if output_attentions:
        kernel = functools.partial(_mha_kernel_probs, num_heads=num_heads,
                                   head_dim=head_dim)
        out_specs = (ctx_spec,
                     pl.BlockSpec((1, num_heads, tq, S), lambda b, s: (b, 0, s, 0)))
        out_shape = (ctx_shape,
                     jax.ShapeDtypeStruct((B, num_heads, S, S), probs_dtype))
    else:
        kernel = functools.partial(_mha_kernel, num_heads=num_heads,
                                   head_dim=head_dim)
        out_specs = ctx_spec
        out_shape = ctx_shape

    out = pl.pallas_call(
        kernel,
        grid=(B, S // tq),
        in_specs=in_specs,
        out_specs=out_specs,
        out_shape=out_shape,
        compiler_params=_compiler_params(("parallel", "parallel")),
    )(mask_add, q, k, v)

    if output_attentions:
        return out[0], out[1]
    return out, None


# --------------------------------------------------------------------------- #
# Kernel 3: attn-output proj + residual/LN + GELU FFN (I-tiled) + residual/LN   #
# --------------------------------------------------------------------------- #
def _out_ffn_kernel(x_ref, ctx_ref, wao_ref, bao_ref, g1_ref, b1_ref,
                    wi_ref, bi_ref, wo_ref, bo_ref, g2_ref, b2_ref,
                    y_ref, h1_ref, acc_ref):
    kI = pl.program_id(2)

    @pl.when(kI == 0)
    def _():
        # BertSelfOutput: dense + residual + LayerNorm (dropout = identity).
        x = x_ref[0].astype(jnp.float32)                         # (TS, H) residual
        a = jnp.dot(ctx_ref[0], wao_ref[...],
                    preferred_element_type=jnp.float32) + bao_ref[...]
        h1_ref[...] = _layer_norm(a + x, g1_ref[...], b1_ref[...])
        acc_ref[...] = jnp.zeros_like(acc_ref)

    # BertIntermediate (exact GELU) + BertOutput, accumulated over I chunks.
    inter = _gelu(jnp.dot(h1_ref[...].astype(jnp.bfloat16), wi_ref[...],
                          preferred_element_type=jnp.float32) + bi_ref[...])
    acc_ref[...] += jnp.dot(inter.astype(jnp.bfloat16), wo_ref[...],
                            preferred_element_type=jnp.float32)

    @pl.when(kI == pl.num_programs(2) - 1)
    def _():
        out = acc_ref[...] + bo_ref[...]
        y_ref[0] = _layer_norm(out + h1_ref[...], g2_ref[...],
                               b2_ref[...]).astype(y_ref.dtype)


def _out_ffn(x, ctx, p, ts):
    B, S, H = x.shape
    I = p["wi"].shape[1]
    tI = _intermediate_tile(I)

    def tile_spec(last):
        return pl.BlockSpec((1, ts, last), lambda b, s, kI: (b, s, 0))

    return pl.pallas_call(
        _out_ffn_kernel,
        grid=(B, S // ts, I // tI),
        in_specs=[
            tile_spec(H),                                        # residual x (bf16)
            tile_spec(H),                                        # attention ctx (bf16)
            _const_spec((H, H), lambda b, s, kI: (0, 0)),        # W_attn_out
            _const_spec((1, H), lambda b, s, kI: (0, 0)),        # b_attn_out
            _const_spec((1, H), lambda b, s, kI: (0, 0)),        # LN1 gamma
            _const_spec((1, H), lambda b, s, kI: (0, 0)),        # LN1 beta
            pl.BlockSpec((H, tI), lambda b, s, kI: (0, kI)),     # W_intermediate chunk
            pl.BlockSpec((1, tI), lambda b, s, kI: (0, kI)),     # b_intermediate chunk
            pl.BlockSpec((tI, H), lambda b, s, kI: (kI, 0)),     # W_output chunk
            _const_spec((1, H), lambda b, s, kI: (0, 0)),        # b_output
            _const_spec((1, H), lambda b, s, kI: (0, 0)),        # LN2 gamma
            _const_spec((1, H), lambda b, s, kI: (0, 0)),        # LN2 beta
        ],
        out_specs=pl.BlockSpec((1, ts, H), lambda b, s, kI: (b, s, 0)),
        out_shape=jax.ShapeDtypeStruct((B, S, H), jnp.bfloat16),
        scratch_shapes=[pltpu.VMEM((ts, H), jnp.float32),        # h1 (post-LN1)
                        pltpu.VMEM((ts, H), jnp.float32)],       # FFN accumulator
        compiler_params=_compiler_params(("parallel", "parallel", "arbitrary")),
    )(x, ctx, p["wao"], p["bao"], p["g1"], p["b1"],
      p["wi"], p["bi"], p["wo"], p["bo"], p["g2"], p["b2"])


# --------------------------------------------------------------------------- #
# Layer / encoder wrappers                                                      #
# --------------------------------------------------------------------------- #
def _prepare_layer_params(p, num_heads):
    """Fold 1/sqrt(dh) into Wq/bq, fuse QKV, cast matmul weights to bf16."""
    H = p["wq"].shape[0]
    assert H % num_heads == 0
    scale = 1.0 / math.sqrt(H // num_heads)
    bf16 = jnp.bfloat16
    wq = p["wq"] * scale
    bq = p["bq"] * scale
    return dict(
        w_qkv=jnp.concatenate([wq, p["wk"], p["wv"]], axis=1).astype(bf16),
        b_qkv=jnp.concatenate([bq, p["bk"], p["bv"]], axis=1).astype(jnp.float32),
        wao=p["wao"].astype(bf16), bao=p["bao"],
        g1=p["g1"], b1=p["b1"],
        wi=p["wi"].astype(bf16), bi=p["bi"],
        wo=p["wo"].astype(bf16), bo=p["bo"],
        g2=p["g2"], b2=p["b2"],
    )


def _prepare_mask(attention_mask, B, S):
    if attention_mask is None:
        return jnp.zeros((B, 1, S), jnp.float32)
    m = jnp.asarray(attention_mask)
    if m.ndim == 4:
        if m.shape[1] != 1 or m.shape[2] != 1:
            raise NotImplementedError(
                "Only broadcastable [B,1,1,S] additive masks are supported; "
                "per-query [B,1,S,S] masks are not.")
        m = m[:, 0, 0, :]
    elif m.ndim == 3:
        if m.shape[1] != 1:
            raise NotImplementedError("Expected a [B,1,S] broadcastable mask.")
        m = m[:, 0, :]
    elif m.ndim != 2:
        raise ValueError(f"Unsupported attention_mask shape {m.shape}")
    return m.reshape(B, 1, S).astype(jnp.float32)


def bert_layer(x, mask_add, prepared, num_heads, output_attentions,
               attn_probs_dtype=jnp.bfloat16):
    B, S, H = x.shape
    assert H % num_heads == 0
    dh = H // num_heads
    vmem_limit, seq_target = _tpu_defaults()
    ts = _seq_tile(S, seq_target)
    tq = _attention_seq_tile(ts, num_heads, S, vmem_limit)

    # 1) fused QKV projection -> lane-dense (B,S,H) Q/K/V (no XLA transposes).
    q, k, v = _qkv_proj(x, prepared["w_qkv"], prepared["b_qkv"], ts)

    # 2) multi-head self-attention (heads split in-kernel, ctx stored lane-dense).
    ctx, attn_probs = _attention(q, k, v, mask_add, tq, num_heads, dh,
                                 output_attentions, attn_probs_dtype)

    # 3) attention output projection + residual/LN + I-tiled GELU FFN + residual/LN.
    y = _out_ffn(x, ctx, prepared, ts)
    return y, attn_probs


def bert_encoder(hidden_states, attention_mask, layer_params, num_heads,
                 output_attentions=True, output_hidden_states=True,
                 attn_probs_dtype=jnp.bfloat16):
    """Mirrors BertEncoder.forward (eval semantics: dropout = identity).

    Accuracy contract: matmuls use bf16 operands with f32 accumulation; the
    residual stream between layers and the attention-probs output are bf16
    (pass attn_probs_dtype=jnp.float32 for f32 probs).
    """
    B, S, _ = hidden_states.shape
    mask_add = _prepare_mask(attention_mask, B, S)
    prepared = [_prepare_layer_params(p, num_heads) for p in layer_params]

    # Residual stream carried in bf16 between layers; LN/softmax math is f32 in-kernel.
    hidden_states = hidden_states.astype(jnp.bfloat16)

    all_hidden_states = ()
    all_attentions = ()
    for p in prepared:
        if output_hidden_states:
            all_hidden_states = all_hidden_states + (hidden_states,)
        hidden_states, attn_probs = bert_layer(hidden_states, mask_add, p,
                                               num_heads, output_attentions,
                                               attn_probs_dtype)
        if output_attentions:
            all_attentions = all_attentions + (attn_probs,)
    if output_hidden_states:
        all_hidden_states = all_hidden_states + (hidden_states,)

    outputs = (hidden_states,)
    if output_hidden_states:
        outputs = outputs + (all_hidden_states,)
    if output_attentions:
        outputs = outputs + (all_attentions,)
    return outputs


def init_layer_params(key, H, I, std=0.02):
    ks = jax.random.split(key, 6)
    f32 = jnp.float32
    return dict(
        wq=jax.random.normal(ks[0], (H, H), f32) * std, bq=jnp.zeros((1, H), f32),
        wk=jax.random.normal(ks[1], (H, H), f32) * std, bk=jnp.zeros((1, H), f32),
        wv=jax.random.normal(ks[2], (H, H), f32) * std, bv=jnp.zeros((1, H), f32),
        wao=jax.random.normal(ks[3], (H, H), f32) * std, bao=jnp.zeros((1, H), f32),
        g1=jnp.ones((1, H), f32), b1=jnp.zeros((1, H), f32),
        wi=jax.random.normal(ks[4], (H, I), f32) * std, bi=jnp.zeros((1, I), f32),
        wo=jax.random.normal(ks[5], (I, H), f32) * std, bo=jnp.zeros((1, H), f32),
        g2=jnp.ones((1, H), f32), b2=jnp.zeros((1, H), f32),
    )


if __name__ == "__main__":
    # Small config: batch=2, seq=8, hidden=32, heads=4, intermediate=64, layers=2
    B, S, H, NH, I, L = 2, 8, 32, 4, 64, 2

    key = jax.random.PRNGKey(0)
    k_x, k_p = jax.random.split(key)
    hidden_states = jax.random.normal(k_x, (B, S, H), jnp.float32)

    # Standard extended attention mask: all positions valid -> zeros, [B,1,1,S].
    binary_mask = jnp.ones((B, S), jnp.float32)
    extended_mask = (1.0 - binary_mask)[:, None, None, :] * -10000.0

    layer_params = [init_layer_params(k, H, I) for k in jax.random.split(k_p, L)]

    outputs = bert_encoder(hidden_states, extended_mask, layer_params, NH,
                           output_attentions=True, output_hidden_states=True)
    jax.block_until_ready(outputs)

    final_hidden = outputs[0]
    assert final_hidden.shape == (B, S, H)
    assert len(outputs[1]) == L + 1                      # all_hidden_states
    assert len(outputs[2]) == L                          # all_attentions
    assert outputs[2][0].shape == (B, NH, S, S)
    assert bool(jnp.all(jnp.isfinite(final_hidden.astype(jnp.float32))))
    # attention probabilities should be (approximately) normalized rows
    row_sums = jnp.sum(outputs[2][0].astype(jnp.float32), axis=-1)
    assert bool(jnp.all(jnp.abs(row_sums - 1.0) < 2e-2))

    # Exercise the perf-default path: no attention-probs output allocated.
    outputs_np = bert_encoder(hidden_states, extended_mask, layer_params, NH,
                              output_attentions=False, output_hidden_states=False)
    jax.block_until_ready(outputs_np)
    assert outputs_np[0].shape == (B, S, H)
    assert bool(jnp.all(jnp.isfinite(outputs_np[0].astype(jnp.float32))))

    print("KERNEL_OK")
</pallas_src>

<mosaic_0001>
module attributes {stable_mosaic.version = 11 : i64} {
  func.func @_qkv_proj_kernel(%arg0: i32, %arg1: i32, %arg2: memref<1x8x32xbf16, #tpu.memory_space<vmem>>, %arg3: memref<32x96xbf16, #tpu.memory_space<vmem>>, %arg4: memref<1x96xf32, #tpu.memory_space<vmem>>, %arg5: memref<1x8x32xbf16, #tpu.memory_space<vmem>>, %arg6: memref<1x8x32xbf16, #tpu.memory_space<vmem>>, %arg7: memref<1x8x32xbf16, #tpu.memory_space<vmem>>) attributes {dimension_semantics = [#tpu.dimension_semantics<parallel>, #tpu.dimension_semantics<parallel>], iteration_bounds = array<i64: 2, 1>, scalar_prefetch = 0 : i64, scratch_operands = 0 : i64, tpu.core_type = #tpu.core_type<tc>, window_params = [{transform_indices = @transform_0, window_bounds = array<i64: 1, 8, 32>}, {pipeline_mode = #tpu.pipeline_mode<synchronous>, transform_indices = @transform_1, window_bounds = array<i64: 32, 96>}, {pipeline_mode = #tpu.pipeline_mode<synchronous>, transform_indices = @transform_2, window_bounds = array<i64: 1, 96>}, {transform_indices = @transform_3, window_bounds = array<i64: 1, 8, 32>}, {transform_indices = @transform_4, window_bounds = array<i64: 1, 8, 32>}, {transform_indices = @transform_5, window_bounds = array<i64: 1, 8, 32>}]} {
    %c0 = arith.constant 0 : index
    %c0_0 = arith.constant 0 : index
    %c0_1 = arith.constant 0 : index
    %0 = vector.load %arg2[%c0, %c0_0, %c0_1] : memref<1x8x32xbf16, #tpu.memory_space<vmem>>, vector<1x8x32xbf16>
    %1 = vector.shape_cast %0 : vector<1x8x32xbf16> to vector<8x32xbf16>
    %c0_2 = arith.constant 0 : index
    %c0_3 = arith.constant 0 : index
    %2 = vector.load %arg3[%c0_2, %c0_3] : memref<32x96xbf16, #tpu.memory_space<vmem>>, vector<32x96xbf16>
    %cst = arith.constant dense<0.000000e+00> : vector<8x96xf32>
    %3 = tpu.matmul %1, %2, %cst {dimension_numbers = #tpu.dot_dimension_numbers<[1], [0], [0], [1], [0, 0, 1, 1], [], []>} : vector<8x32xbf16>, vector<32x96xbf16>, vector<8x96xf32> -> vector<8x96xf32>
    %c0_4 = arith.constant 0 : index
    %c0_5 = arith.constant 0 : index
    %4 = vector.load %arg4[%c0_4, %c0_5] : memref<1x96xf32, #tpu.memory_space<vmem>>, vector<1x96xf32>
    %5 = vector.broadcast %4 : vector<1x96xf32> to vector<8x96xf32>
    %6 = arith.addf %3, %5 : vector<8x96xf32>
    %7 = arith.truncf %6 : vector<8x96xf32> to vector<8x96xbf16>
    %8 = vector.extract_strided_slice %7 {offsets = [0, 0], sizes = [8, 32], strides = [1, 1]} : vector<8x96xbf16> to vector<8x32xbf16>
    %c0_6 = arith.constant 0 : index
    %c0_7 = arith.constant 0 : index
    %c0_8 = arith.constant 0 : index
    %9 = vector.load %arg5[%c0_6, %c0_7, %c0_8] : memref<1x8x32xbf16, #tpu.memory_space<vmem>>, vector<1x8x32xbf16>
    %10 = vector.shape_cast %9 : vector<1x8x32xbf16> to vector<8x32xbf16>
    %11 = vector.shape_cast %8 : vector<8x32xbf16> to vector<1x8x32xbf16>
    tpu.vector_store %arg5[%c0_6, %c0_7, %c0_8], %11 {strides = array<i32>} : memref<1x8x32xbf16, #tpu.memory_space<vmem>>, vector<1x8x32xbf16>,
    %12 = vector.extract_strided_slice %7 {offsets = [0, 32], sizes = [8, 32], strides = [1, 1]} : vector<8x96xbf16> to vector<8x32xbf16>
    %c0_9 = arith.constant 0 : index
    %c0_10 = arith.constant 0 : index
    %c0_11 = arith.constant 0 : index
    %13 = vector.load %arg6[%c0_9, %c0_10, %c0_11] : memref<1x8x32xbf16, #tpu.memory_space<vmem>>, vector<1x8x32xbf16>
    %14 = vector.shape_cast %13 : vector<1x8x32xbf16> to vector<8x32xbf16>
    %15 = vector.shape_cast %12 : vector<8x32xbf16> to vector<1x8x32xbf16>
    tpu.vector_store %arg6[%c0_9, %c0_10, %c0_11], %15 {strides = array<i32>} : memref<1x8x32xbf16, #tpu.memory_space<vmem>>, vector<1x8x32xbf16>,
    %16 = vector.extract_strided_slice %7 {offsets = [0, 64], sizes = [8, 32], strides = [1, 1]} : vector<8x96xbf16> to vector<8x32xbf16>
    %c0_12 = arith.constant 0 : index
    %c0_13 = arith.constant 0 : index
    %c0_14 = arith.constant 0 : index
    %17 = vector.load %arg7[%c0_12, %c0_13, %c0_14] : memref<1x8x32xbf16, #tpu.memory_space<vmem>>, vector<1x8x32xbf16>
    %18 = vector.shape_cast %17 : vector<1x8x32xbf16> to vector<8x32xbf16>
    %19 = vector.shape_cast %16 : vector<8x32xbf16> to vector<1x8x32xbf16>
    tpu.vector_store %arg7[%c0_12, %c0_13, %c0_14], %19 {strides = array<i32>} : memref<1x8x32xbf16, #tpu.memory_space<vmem>>, vector<1x8x32xbf16>,
    return
  }
  func.func @transform_0(%arg0: i32, %arg1: i32) -> (i32, i32, i32) {
    %c0_i32 = arith.constant 0 : i32
    %c0_i32_0 = arith.constant 0 : i32
    return %arg0, %arg1, %c0_i32 : i32, i32, i32
  }
  func.func @transform_1(%arg0: i32, %arg1: i32) -> (i32, i32) {
    %c0_i32 = arith.constant 0 : i32
    %c0_i32_0 = arith.constant 0 : i32
    %c0_i32_1 = arith.constant 0 : i32
    return %c0_i32, %c0_i32_0 : i32, i32
  }
  func.func @transform_2(%arg0: i32, %arg1: i32) -> (i32, i32) {
    %c0_i32 = arith.constant 0 : i32
    %c0_i32_0 = arith.constant 0 : i32
    %c0_i32_1 = arith.constant 0 : i32
    return %c0_i32, %c0_i32_0 : i32, i32
  }
  func.func @transform_3(%arg0: i32, %arg1: i32) -> (i32, i32, i32) {
    %c0_i32 = arith.constant 0 : i32
    %c0_i32_0 = arith.constant 0 : i32
    return %arg0, %arg1, %c0_i32 : i32, i32, i32
  }
  func.func @transform_4(%arg0: i32, %arg1: i32) -> (i32, i32, i32) {
    %c0_i32 = arith.constant 0 : i32
    %c0_i32_0 = arith.constant 0 : i32
    return %arg0, %arg1, %c0_i32 : i32, i32, i32
  }
  func.func @transform_5(%arg0: i32, %arg1: i32) -> (i32, i32, i32) {
    %c0_i32 = arith.constant 0 : i32
    %c0_i32_0 = arith.constant 0 : i32
    return %arg0, %arg1, %c0_i32 : i32, i32, i32
  }
}

</mosaic_0001>

<bundles_post_ra>
// kernel: tpu_custom_call.1
= control target key start
LH: loop header
LB: loop body
LE: loop exit
PB: predicated region body
PF: predicated region fallthrough
CT: control target
= control target key end

     0   :  { %11 = vsyncpa [#allocation3], 0  ;;  %s1258_s0 = inlined_call_operand.hbm [shape: bf16[2,8,32], index: 0, kind: input, shape index: {}]   ;;  %s1259_s1 = inlined_call_operand.hbm [shape: bf16[32,96], index: 1, kind: input, shape index: {}]   ;;  %s1260_s2 = inlined_call_operand.vmem [shape: f32[1,96], index: 2, kind: input, shape index: {}]   ;;  %s1261_s3 = inlined_call_operand.hbm [shape: bf16[2,8,32], index: 3, kind: output, shape index: {0}]   ;;  %s1262_s4 = inlined_call_operand.hbm [shape: bf16[2,8,32], index: 4, kind: output, shape index: {1}]   ;;  %s1263_s5 = inlined_call_operand.hbm [shape: bf16[2,8,32], index: 5, kind: output, shape index: {2}]  }
   0x1   :  { %13 = vsyncpa [#allocation3 + $0x1], 0 }
   0x2   :  { %14 = vsyncpa [#allocation6], 0 }
   0x3   :  { %15 = vsyncpa [#allocation4], 0 }
   0x4   :  { %17 = vsyncpa [#allocation4 + $0x1], 0 }
   0x5   :  { %18 = vsyncpa [#allocation9], 0 }
   0x6   :  { %20 = vsyncpa [#allocation9 + $0x1], 0  ;;  %s959_s18 = smov 0   ;;  %s961_s19 = smov 0  }
   0x7   :  { %s963_s20 = smov 0   ;;  %s965_s21 = smov 0  }
   0x8   :  { %s967_s22 = smov 0   ;;  %s969_s23 = smov 0  }
   0x9 LB: > { %s990_s24 = sadd.s32 4294967295, %s916_s23   ;;  %s1267_s25 = sadd.s32 4294967294, %s916_s23   ;;  %s916_s23 = sphi %s969_s23, %s26_s23   ;;  %s912_s22 = sphi %s967_s22, %s1287_s22   ;;  %s908_s21 = sphi %s965_s21, %s1286_s21   ;;  %s904_s20 = sphi %s963_s20, %s1285_s20   ;;  %s900_s19 = sphi %s961_s19, %s1284_s19   ;;  %s896_s18 = sphi %s959_s18, %s1283_s18  }
   0xa   : > { %p60_p0 = scmp.ne.s32.totalorder %s900_s19, %s896_s18  ;;  %p1264_p1 = scmp.eq.s32.totalorder %s990_s24, 0 }
   0xb   : > { %p134_p3 = scmp.eq.s32.totalorder %s1267_s25, 1  ;;  %p585_p5 = scmp.ge.s32.totalorder %s916_s23, 1 }
   0xc   : > { %p1001_p4 = por %p1264_p1, %p60_p0  ;;  %p197_p7 = scmp.lt.s32.totalorder %s916_s23, 3 }
   0xd   : > { %p1006_p6 = por %p134_p3, %p60_p0  ;;  %s918_s29 = smov [#allocation5]  }
   0xe   : > { %s1268_s26 = scalar_select %p1001_p4, 1, 0 }
   0xf   : > { %s1269_s27 = scalar_select %p1006_p6, 1, 0 }
  0x10   : > { %p1011_p8 = pnand %p585_p5, %p197_p7  ;;  %s209_s30 = sshll.u32 %s918_s29, 4  ;;  %s210_s30 = int_to_ptr.vmem [resolvable:$true] %s209_s30 }
  0x11   : > { %s38_s7 = sadd.s32 1, %s912_s22  ;;  %s712_s10 = scalar_lea.hbm %s1259_s1, 256 }
  0x12   : > { %s1270_s28 = scalar_select %p1011_p8, 1, 0 }
  0x13   : > { %p633_p9 = pneg %p1011_p8  ;;  %p713_p12 = scmp.ne.s32.totalorder %s1259_s1, %s712_s10 }
  0x14   : > { %p719_p5 = scmp.lt.u32.totalorder %s712_s10, %s1259_s1 }
  0x15   : > { %p1020_p11 = pnand %p633_p9, %p1264_p1 }
  0x17   : > { %p714_p13 = pneg %p1020_p11 }
  0x19   : > { %p715_p0 = pnand %p714_p13, %p713_p12 }
  0x1b   : > { %p716_p3 = pneg %p715_p0 }
  0x1d   : > { %p721_p7 = pnand %p719_p5, %p716_p3 }
  0x1f   : > { %724 = shalt.err (!%p721_p7)
}
  0x20   : > { %s725_s15 = scalar_lea.vmem %s210_s30, 256  ;;  %p733_p2 = scmp.lt.s32.totalorder %s210_s30, %s210_s30 }
  0x21   : > { %p726_p9 = scmp.ne.s32.totalorder %s210_s30, %s725_s15  ;;  %p734_p6 = scmp.lt.s32.totalorder %s725_s15, %s725_s15 }
  0x23   : > { %p728_p10 = pnand %p726_p9, %p714_p13  ;;  %p735_p4 = por %p734_p6, %p733_p2 }
  0x25   : > { %p729_p1 = pneg %p728_p10 }
  0x27   : > { %p736_p8 = pnand %p735_p4, %p729_p1 }
  0x29   : > { %739 = shalt.err (!%p736_p8)
}
  0x2a   : > { %s919_s16 = smov 64   ;;  %s920_s17 = smov 4  }
  0x2b   : > { %636 = dma.hbm_to_vmem [thread:$0]  (!%p1020_p11), %s1259_s1, 256, %s210_s30, [#allocation6], %s919_s16, %s919_s16, %s920_s17  }
  0x2c   : > { %p40_p1 = scmp.ge.s32.totalorder %s38_s7, 2  ;;  %s47_s9 = sadd.s32 1, %s904_s20 }
  0x2d   : > { %p54_p2 = scmp.ne.s32.totalorder %s904_s20, %s900_s19  ;;  %p55_p4 = scmp.eq.s32.totalorder %s916_s23, 0 }
  0x2e   : > { %s1289_s7 = smov (%p40_p1, %s38_s7), 0  ;;  %p1273_p8 = scmp.eq.s32.totalorder %s990_s24, 1 }
  0x2f   : > { %p1047_p6 = por %p55_p4, %p54_p2  ;;  %s42_s6 = ssub.s32 %s912_s22, %s1289_s7 }
  0x30   : > { %p1053_p10 = por %p1273_p8, %p54_p2  ;;  %p652_p12 = scmp.lt.s32.totalorder %s916_s23, 2 }
  0x31   : > { %p45_p11 = scmp.eq.s32.totalorder %s42_s6, 0  ;;  %s226_s30 = sand.u32 1, %s904_s20  }
  0x32   : > { %s588_s12 = sshll.u32 %s226_s30, 2  ;;  %s589_s14 = sshll.u32 %s912_s22, 6 }
  0x33   : > { %s1062_s13 = scalar_select %p45_p11, %s904_s20, %s47_s9  }
  0x34   : > { %s1068_s17 = scalar_lea.hbm %s1258_s0, %s589_s14  ;;  %s230_s29 = scalar_lea.vmem [#allocation2], %s588_s12 }
  0x35   : > { %s238_s8 = sshll.u32 %s230_s29, 4  ;;  %p1074_p13 = pnand %p652_p12, %p1047_p6  ;;  %s1070_s8 = int_to_ptr.vmem [resolvable:$true] %s238_s8 }
  0x36   : > { %s227_s9 = scalar_lea.sflag [#allocation3], %s226_s30  ;;  %s740_s25 = scalar_lea.hbm %s1068_s17, 64 }
  0x37   : > { %p741_p0 = scmp.ne.s32.totalorder %s1068_s17, %s740_s25  ;;  %p742_p3 = pneg %p1074_p13 }
  0x38   : > { %s745_s15 = scalar_lea.hbm %s1258_s0, 128  ;;  %p746_p9 = scmp.lt.u32.totalorder %s1068_s17, %s1258_s0 }
  0x39   : > { %p743_p5 = pnand %p742_p3, %p741_p0  ;;  %p747_p1 = scmp.lt.u32.totalorder %s745_s15, %s740_s25 }
  0x3a   : > { %p749_p4 = scmp.lt.u32.totalorder %s740_s25, %s1068_s17 }
  0x3b   : > { %p744_p7 = pneg %p743_p5  ;;  %p748_p2 = por %p747_p1, %p746_p9 }
  0x3d   : > { %p750_p6 = por %p749_p4, %p748_p2 }
  0x3f   : > { %p751_p8 = pnand %p750_p6, %p744_p7 }
  0x41   : > { %754 = shalt.err (!%p751_p8)
}
  0x42   : > { %s755_s30 = scalar_lea.vmem %s1070_s8, 64  ;;  %s921_s29 = smov [#allocation2]  }
  0x43   : > { %p756_p12 = scmp.ne.s32.totalorder %s1070_s8, %s755_s30  ;;  %s760_s12 = sshll.u32 %s921_s29, 4  ;;  %s761_s12 = int_to_ptr.vmem [resolvable:$false] %s760_s12 }
  0x44   : > { %s762_s14 = scalar_lea.vmem %s761_s12, 128  ;;  %p763_p5 = scmp.lt.s32.totalorder %s1070_s8, %s761_s12 }
  0x45   : > { %p758_p11 = pnand %p756_p12, %p742_p3  ;;  %p764_p9 = scmp.lt.s32.totalorder %s762_s14, %s755_s30 }
  0x47   : > { %p759_p0 = pneg %p758_p11  ;;  %p765_p1 = por %p764_p9, %p763_p5 }
  0x49   : > { %p766_p2 = pnand %p765_p1, %p759_p0 }
  0x4b   : > { %769 = shalt.err (!%p766_p2)
}
  0x4c   : > { %640 = dma.hbm_to_vmem [thread:$0]  (!%p1074_p13), %s1068_s17, 64, %s1070_s8, %s227_s9  }
  0x4d   : > { %p1276_p7 = scmp.ne.s32.totalorder %s1270_s28, 0 }
  0x4e   : > { %s1106_s25 = sand.u32 (!%p1276_p7), 1, %s900_s19   ;;  %p1277_p3 = scmp.ne.s32.totalorder (!%p1276_p7), %s1268_s26, 0 }
  0x4f   : > { %247 = sbr.rel (%p1276_p7) target bundleno = 467 (0x1d3), region = 32  ;;  %s1109_s15 = sshll.u32 (!%p1276_p7), %s1106_s25, 2 }
  0x50   : > { %s250_s10 = scalar_lea.sflag (!%p1276_p7), [#allocation3], %s1106_s25  ;;  %s253_s16 = scalar_lea.vmem (!%p1276_p7), [#allocation2], %s1109_s15 }
  0x56   : > { %879 = dma.done.wait (%p1277_p3), %s250_s10, 64  }
  0x57   : > { %881 = vsyncadd (%p1277_p3), %s250_s10, 4294967232  ;;  %p1278_p13 = scmp.eq.s32.totalorder %s990_s24, 0 }
  0x59   : > { %883 = dma.done.wait (%p1278_p13), [#allocation6], 256   ;;  %p1279_p4 = pmov %p1278_p13 }
  0x5a   : > { %v922_v0 = vmov 0.0   ;;  %vm923_vm0 = vmmov 0   ;;  %v710_v1 = vld [vmem:[#allocation5] sm:$0xff]   ;;  %v711_v2 = vld [vmem:[#allocation5 + $0x8] sm:$0xff]   ;;  %v295_v3 = vld [vmem:[%s253_s16] sm:$0xf] }
  0x5b   : > { %885 = vsyncadd (%p1279_p4), [#allocation6], 4294967040  ;;  %613 = vmatprep.subr.bf16.mxu0 %v922_v0  ;;  %617 = vmatprep.mubr.msk.bf16.mxu0 %vm923_vm0, %v922_v0  ;;  %vm319_vm1 = vcmask 261120   ;;  %v596_v4 = vld [vmem:[%s1260_s2] ss:$0 sm:$0xff]  ;;  %s1125_s17 = sshll.u32 %s908_s21, 6 }
  0x5c   : > { %614 = vmatpush3.bf16.msra.mxu0 %v710_v1  ;;  %s279_s8 = scalar_lea.vmem [#allocation7], %s1109_s15  ;;  %vm364_vm2 = vcmask 257024   ;;  %s1132_s29 = scalar_lea.hbm %s1261_s3, %s1125_s17 }
  0x5d   : > { %615 = vmatprep.subr.bf16.mxu0 %v922_v0  ;;  %s402_s6 = sshll.u32 %s279_s8, 4  ;;  %s924_s21 = smov 96   ;;  %s1134_s6 = int_to_ptr.vmem [resolvable:$true] %s402_s6 }
  0x5e   : > { %s378_s12 = scalar_lea.sflag [#allocation4], %s1106_s25  ;;  %s770_s14 = scalar_lea.vmem %s1134_s6, 64 }
  0x5f   : > { %p771_p6 = scmp.ne.s32.totalorder %s1134_s6, %s770_s14  ;;  %s925_s10 = smov [#allocation7]  }
  0x60   : > { %616 = vmatpush3.bf16.msra.mxu0 %v711_v2  ;;  %s774_s16 = sshll.u32 %s925_s10, 4  ;;  %s775_s16 = int_to_ptr.vmem [resolvable:$false] %s774_s16 }
  0x61   : > { %p772_p8 = pnand %p771_p6, %p1053_p10  ;;  %s776_s26 = scalar_lea.vmem %s775_s16, 128 }
  0x62   : > { %p777_p11 = scmp.lt.s32.totalorder %s1134_s6, %s775_s16  ;;  %p778_p0 = scmp.lt.s32.totalorder %s776_s26, %s770_s14 }
  0x63   : > { %618 = vmatmul.mubr.msk.bf16.vlgmr.msra.gmra.mrb[0].mxu0 %vm319_vm1, %v295_v3  ;;  %p773_p12 = pneg %p772_p8 }
  0x64   : > { %p779_p5 = por %p778_p0, %p777_p11 }
  0x66   : > { %p780_p9 = pnand %p779_p5, %p773_p12 }
 0x136   : > { %v357_v5 = vpop.f32.mrb[0].mxu0 }
 0x137   : > { %v358_v6 = vadd.f32 %v596_v4, %v357_v5  ;;  %v619_v7 = vpop.f32.mrb[1].mxu0 }
 0x138   : > { %v360_v8 = vpop.f32.mrb[2].mxu0 }
 0x139   : > { %v363_v9 = vpack.c.bf16 %v358_v6, %v358_v6  ;;  %v620_v10 = vpop.f32.mrb[3].mxu0 }
 0x13b   : > { %369 = vrot.lane.b32.xlu0 %v363_v9, %s924_s21  ;;  %365 = vst.msk [vmem:[%s279_s8] sm:$0xf] %vm364_vm2, %v363_v9 }
 0x13c   : > { %783 = shalt.err (!%p780_p9)
}
 0x13d   : > { %s784_s25 = scalar_lea.hbm %s1132_s29, 64  ;;  %s788_s9 = scalar_lea.hbm %s1261_s3, 128 }
 0x13e   : > { %p785_p1 = scmp.ne.s32.totalorder %s1132_s29, %s784_s25  ;;  %p789_p3 = scmp.lt.u32.totalorder %s1132_s29, %s1261_s3 }
 0x13f   : > { %p790_p13 = scmp.lt.u32.totalorder %s788_s9, %s784_s25  ;;  %p792_p6 = scmp.lt.u32.totalorder %s784_s25, %s1132_s29 }
 0x140   : > { %p786_p2 = pnand %p785_p1, %p1053_p10 }
 0x141   : > { %p791_p4 = por %p790_p13, %p789_p3 }
 0x142   : > { %p787_p7 = pneg %p786_p2 }
 0x143   : > { %p793_p8 = por %p792_p6, %p791_p4 }
 0x145   : > { %p794_p12 = pnand %p793_p8, %p787_p7 }
 0x147   : > { %797 = shalt.err (!%p794_p12)
}
 0x148   : > { %627 = dma.vmem_to_hbm [thread:$0]  (%p1053_p10), %s1134_s6, 64, %s1132_s29, %s378_s12  }
 0x149   : > { %s926_s14 = smov 64   ;;  %s382_s10 = sand.u32 1, %s990_s24  }
 0x14a   : > { %373 = vrot.lane.b32.xlu0 %v363_v9, %s926_s14  ;;  %s286_s16 = scalar_lea.vmem [#allocation8], %s1109_s15  ;;  %s1165_s8 = scalar_lea.hbm %s1262_s4, %s1125_s17 }
 0x14b   : > { %s416_s26 = sshll.u32 %s286_s16, 4  ;;  %s293_s9 = scalar_lea.vmem [#allocation10], %s1109_s15  ;;  %s1167_s26 = int_to_ptr.vmem [resolvable:$true] %s416_s26 }
 0x14c   : > { %s1172_s30 = sshll.u32 %s293_s9, 4  ;;  %s1175_s24 = scalar_lea.sflag [#allocation9], %s382_s10  ;;  %s1206_s30 = int_to_ptr.vmem [resolvable:$true] %s1172_s30 }
 0x14d   : > { %s798_s6 = scalar_lea.vmem %s1167_s26, 64  ;;  %s927_s29 = smov [#allocation8]  }
 0x14e   : > { %p799_p11 = scmp.ne.s32.totalorder %s1167_s26, %s798_s6  ;;  %s802_s12 = sshll.u32 %s927_s29, 4  ;;  %s803_s12 = int_to_ptr.vmem [resolvable:$false] %s802_s12 }
 0x14f   : > { %s804_s21 = scalar_lea.vmem %s803_s12, 128  ;;  %p805_p9 = scmp.lt.s32.totalorder %s1167_s26, %s803_s12 }
 0x150   : > { %p800_p0 = pnand %p799_p11, %p1053_p10  ;;  %p806_p1 = scmp.lt.s32.totalorder %s804_s21, %s798_s6 }
 0x152   : > { %p801_p5 = pneg %p800_p0  ;;  %p807_p2 = por %p806_p1, %p805_p9 }
 0x154   : > { %p808_p7 = pnand %p807_p2, %p801_p5 }
 0x1ad   : > { %v370_v11 = vpop.permute.xlu0 %369 }
 0x1ae   : > { %372 = vst.msk [vmem:[%s286_s16] sm:$0xf] %vm364_vm2, %v370_v11 }
 0x1af   : > { %811 = shalt.err (!%p808_p7)
}
 0x1b0   : > { %s812_s14 = scalar_lea.hbm %s1165_s8, 64  ;;  %s816_s25 = scalar_lea.hbm %s1262_s4, 128 }
 0x1b1   : > { %p813_p3 = scmp.ne.s32.totalorder %s1165_s8, %s812_s14  ;;  %p817_p6 = scmp.lt.u32.totalorder %s1165_s8, %s1262_s4 }
 0x1b2   : > { %p818_p8 = scmp.lt.u32.totalorder %s816_s25, %s812_s14  ;;  %p820_p11 = scmp.lt.u32.totalorder %s812_s14, %s1165_s8 }
 0x1b3   : > { %p814_p13 = pnand %p813_p3, %p1053_p10 }
 0x1b4   : > { %p819_p12 = por %p818_p8, %p817_p6 }
 0x1b5   : > { %p815_p4 = pneg %p814_p13 }
 0x1b6   : > { %p821_p0 = por %p820_p11, %p819_p12 }
 0x1b8   : > { %p822_p5 = pnand %p821_p0, %p815_p4 }
 0x1ba   : > { %825 = shalt.err (!%p822_p5)
}
 0x1bb   : > { %628 = dma.vmem_to_hbm [thread:$0]  (%p1053_p10), %s1167_s26, 64, %s1165_s8, %s1175_s24  }
 0x1bc   : > { %s1203_s21 = scalar_lea.hbm %s1263_s5, %s1125_s17  ;;  %v374_v12 = vpop.permute.xlu0 %373  ;;  %s826_s14 = scalar_lea.vmem %s1206_s30, 64 }
 0x1bd   : > { %376 = vst.msk [vmem:[%s293_s9] sm:$0xf] %vm364_vm2, %v374_v12  ;;  %p827_p9 = scmp.ne.s32.totalorder %s1206_s30, %s826_s14  ;;  %s928_s26 = smov [#allocation10]  }
 0x1be   : > { %s830_s8 = sshll.u32 %s928_s26, 4  ;;  %s831_s8 = int_to_ptr.vmem [resolvable:$false] %s830_s8 }
 0x1bf   : > { %p828_p1 = pnand %p827_p9, %p1053_p10  ;;  %s832_s10 = scalar_lea.vmem %s831_s8, 128 }
 0x1c0   : > { %p833_p7 = scmp.lt.s32.totalorder %s1206_s30, %s831_s8  ;;  %p834_p3 = scmp.lt.s32.totalorder %s832_s10, %s826_s14 }
 0x1c1   : > { %p829_p2 = pneg %p828_p1 }
 0x1c2   : > { %p835_p13 = por %p834_p3, %p833_p7 }
 0x1c4   : > { %p836_p4 = pnand %p835_p13, %p829_p2 }
 0x1c6   : > { %839 = shalt.err (!%p836_p4)
}
 0x1c7   : > { %s840_s15 = scalar_lea.hbm %s1203_s21, 64  ;;  %s844_s16 = scalar_lea.hbm %s1263_s5, 128 }
 0x1c8   : > { %p841_p6 = scmp.ne.s32.totalorder %s1203_s21, %s840_s15  ;;  %p845_p11 = scmp.lt.u32.totalorder %s1203_s21, %s1263_s5 }
 0x1c9   : > { %p846_p0 = scmp.lt.u32.totalorder %s844_s16, %s840_s15  ;;  %p848_p9 = scmp.lt.u32.totalorder %s840_s15, %s1203_s21 }
 0x1ca   : > { %p842_p8 = pnand %p841_p6, %p1053_p10 }
 0x1cb   : > { %p847_p5 = por %p846_p0, %p845_p11 }
 0x1cc   : > { %p843_p12 = pneg %p842_p8 }
 0x1cd   : > { %p849_p1 = por %p848_p9, %p847_p5 }
 0x1cf   : > { %p850_p2 = pnand %p849_p1, %p843_p12 }
 0x1d1   : > { %853 = shalt.err (!%p850_p2)
}
 0x1d2   : > { %629 = dma.vmem_to_hbm [thread:$0]  (%p1053_p10), %s1206_s30, 64, %s1203_s21, %s1175_s24  }
 0x1d3 PF: > { %s442_s29 = sand.u32 1, %s896_s18   ;;  %p1280_p7 = scmp.ne.s32.totalorder %s1269_s27, 0 }
 0x1d4   : > { %p1281_p3 = scmp.ge.s32.totalorder %s916_s23, 2  ;;  %s443_s6 = scalar_lea.sflag [#allocation4], %s442_s29 }
 0x1d6   : > { %p642_p13 = pnand %p1281_p3, %p1280_p7 }
 0x1d8   : > { %887 = dma.done.wait (!%p642_p13), %s443_s6, 64  }
 0x1d9   : > { %889 = vsyncadd (!%p642_p13), %s443_s6, 4294967232  ;;  %s1282_s12 = sadd.s32 4294967294, %s916_s23  }
 0x1da   : > { %s451_s14 = sand.u32 1, %s1282_s12  }
 0x1db   : > { %s452_s26 = scalar_lea.sflag [#allocation9], %s451_s14 }
 0x1dc   : > { %891 = dma.done.wait (!%p642_p13), %s452_s26, 128  }
 0x1dd   : > { %893 = vsyncadd (!%p642_p13), %s452_s26, 4294967168  ;;  %s26_s23 = sadd.s32 1, %s916_s23   ;;  %s1283_s18 = smov %s900_s19 }
 0x1de   : > { %p23_p10 = scmp.ge.s32.totalorder %s26_s23, 4   ;;  %s1284_s19 = smov %s904_s20 }
 0x1df   : > { %s1285_s20 = smov %s1062_s13  ;;  %s1286_s21 = smov %s912_s22 }
 0x1e0   : > { %s1287_s22 = smov %s1289_s7  ;;  %25 = sbr.rel (!%p23_p10) target bundleno = 9 (0x9), region = 113 }
 0x1e7   :  { %466 = vsyncpa [#allocation3], 1 }
 0x1e8   :  { %468 = vsyncpa [#allocation3 + $0x1], 1 }
 0x1e9   :  { %469 = vsyncpa [#allocation6], 1 }
 0x1ea   :  { %470 = vsyncpa [#allocation4], 1 }
 0x1eb   :  { %472 = vsyncpa [#allocation4 + $0x1], 1 }
 0x1ec   :  { %473 = vsyncpa [#allocation9], 1 }
 0x1ed   :  { %475 = vsyncpa [#allocation9 + $0x1], 1 }

</bundles_post_ra>
